<compile_context>
chip_gen: v7x
topology: tpu7x:2x2x1
jax: 0.10.0
libtpu: 0.0.40
codegen_flags: <defaults>
</compile_context>

<pallas_src>
import jax
import jax.numpy as jnp
from jax import lax
from jax.experimental import pallas as pl
from jax.experimental.pallas import tpu as pltpu

# Module hyper-parameters (match the PyTorch source).
N_EMBED = 384
NUM_HEADS = 6
HEAD_SIZE = N_EMBED // NUM_HEADS   # 64
BLOCK_SIZE = 256                   # causal-mask buffer size (T <= BLOCK_SIZE)


def _mha_fused_kernel(x_ref, wqkv_ref, wp_ref, b_ref, o_ref, acc_ref):
    """Fused per-(batch, head) step: causal attention + output-projection accumulate.

    x_ref    : (1, T, C)      bf16   activations (same tile for every h)
    wqkv_ref : (1, C, 3*HS)   bf16   [Wq | Wk | Wv] for head h
    wp_ref   : (1, HS, C)     bf16   rows of the output projection for head h
    b_ref    : (1, C)         f32    projection bias
    o_ref    : (1, T, C)             output (written once, at h == H-1)
    acc_ref  : (T, C)         f32    VMEM accumulator across heads
    """
    h = pl.program_id(1)
    hs = wp_ref.shape[1]

    @pl.when(h == 0)
    def _():
        acc_ref[...] = jnp.zeros_like(acc_ref)

    x = x_ref[0]                                                      # (T, C) bf16

    # Fused QKV projection: one 192-wide matmul instead of three 64-wide ones.
    qkv = jnp.dot(x, wqkv_ref[0], preferred_element_type=jnp.float32)  # (T, 3*HS) f32
    q = qkv[:, :hs]
    k = qkv[:, hs:2 * hs]
    v = qkv[:, 2 * hs:]

    # NOTE: PyTorch source scales by C ** -0.5 with C = n_embed (not head_size).
    scale = jnp.float32(x_ref.shape[2]) ** -0.5

    # Scores: contract the shared last axis directly (no explicit k transpose).
    wei = lax.dot_general(
        q.astype(jnp.bfloat16), k.astype(jnp.bfloat16),
        dimension_numbers=(((1,), (1,)), ((), ())),
        preferred_element_type=jnp.float32) * scale                    # (T, T) f32

    # Causal mask.
    T = wei.shape[0]
    row = lax.broadcasted_iota(jnp.int32, (T, T), 0)
    col = lax.broadcasted_iota(jnp.int32, (T, T), 1)
    wei = jnp.where(col <= row, wei, -jnp.inf)

    # Numerically stable softmax in f32; reciprocal on the EUP.
    wei = wei - jnp.max(wei, axis=-1, keepdims=True)
    p = jnp.exp(wei)
    p = p * pl.reciprocal(jnp.sum(p, axis=-1, keepdims=True), approx=True)

    # Attention output for this head, then fold straight into the projection.
    head_out = jnp.dot(p.astype(jnp.bfloat16), v.astype(jnp.bfloat16),
                       preferred_element_type=jnp.float32)             # (T, HS) f32
    acc_ref[...] += jnp.dot(head_out.astype(jnp.bfloat16), wp_ref[0],
                            preferred_element_type=jnp.float32)        # (T, C) f32

    @pl.when(h == pl.num_programs(1) - 1)
    def _():
        o_ref[0] = (acc_ref[...] + b_ref[...]).astype(o_ref.dtype)


def multi_head_attention(x, wqkv, wp_heads, b_proj):
    """x: (B, T, C) f32.  wqkv: (H, C, 3*HS).  wp_heads: (H, HS, C).  b_proj: (1, C).

    Returns (B, T, C) f32.
    """
    B, T, C = x.shape
    H = wqkv.shape[0]
    HS = wp_heads.shape[1]

    # bf16 MXU inputs (halves activation/weight DMA); accumulation stays f32.
    x_bf = x.astype(jnp.bfloat16)
    wqkv_bf = wqkv.astype(jnp.bfloat16)
    wp_bf = wp_heads.astype(jnp.bfloat16)

    return pl.pallas_call(
        _mha_fused_kernel,
        out_shape=jax.ShapeDtypeStruct((B, T, C), jnp.float32),
        grid=(B, H),   # keep h innermost ("arbitrary"): x tile reused across heads,
                       # output accumulates across heads.  Do NOT reorder to (H, B).
        in_specs=[
            pl.BlockSpec((1, T, C), lambda b, h: (b, 0, 0)),       # x (h-independent)
            pl.BlockSpec((1, C, 3 * HS), lambda b, h: (h, 0, 0)),  # Wqkv per head
            pl.BlockSpec((1, HS, C), lambda b, h: (h, 0, 0)),      # Wproj rows per head
            pl.BlockSpec((1, C), lambda b, h: (0, 0)),             # bias
        ],
        out_specs=pl.BlockSpec((1, T, C), lambda b, h: (b, 0, 0)),  # lane-dense (384)
        scratch_shapes=[pltpu.VMEM((T, C), jnp.float32)],
        compiler_params=pltpu.CompilerParams(
            dimension_semantics=("parallel", "arbitrary")),
    )(x_bf, wqkv_bf, wp_bf, b_proj)


def _reference(x, wq, wk, wv, w_proj, b_proj):
    """Pure-JAX f32 reference mirroring the PyTorch forward (eval mode)."""
    B, T, C = x.shape
    outs = []
    for h in range(wq.shape[0]):
        q = x @ wq[h]
        k = x @ wk[h]
        v = x @ wv[h]
        wei = (q @ jnp.swapaxes(k, -1, -2)) * (C ** -0.5)
        mask = jnp.tril(jnp.ones((T, T), dtype=bool))
        wei = jnp.where(mask, wei, -jnp.inf)
        wei = jax.nn.softmax(wei, axis=-1)
        outs.append(wei @ v)
    cat = jnp.concatenate(outs, axis=-1)
    return cat @ w_proj + b_proj[0]


if __name__ == "__main__":
    B, T, C = 2, 64, N_EMBED   # T <= BLOCK_SIZE

    key = jax.random.PRNGKey(0)
    kx, kq, kk, kv, kp, kb = jax.random.split(key, 6)

    x = jax.random.normal(kx, (B, T, C), dtype=jnp.float32)
    # per-head linear weights, stored as (num_heads, n_embed, head_size)
    wq = 0.02 * jax.random.normal(kq, (NUM_HEADS, C, HEAD_SIZE), dtype=jnp.float32)
    wk = 0.02 * jax.random.normal(kk, (NUM_HEADS, C, HEAD_SIZE), dtype=jnp.float32)
    wv = 0.02 * jax.random.normal(kv, (NUM_HEADS, C, HEAD_SIZE), dtype=jnp.float32)
    # output projection: (C, C) acting on the right, plus bias
    w_proj = 0.02 * jax.random.normal(kp, (C, C), dtype=jnp.float32)
    b_proj = 0.02 * jax.random.normal(kb, (1, C), dtype=jnp.float32)

    # Kernel-side packing: fused QKV weights and per-head projection rows.
    wqkv = jnp.concatenate([wq, wk, wv], axis=-1)          # (H, C, 3*HS)
    wp_heads = w_proj.reshape(NUM_HEADS, HEAD_SIZE, C)     # (H, HS, C)

    out = multi_head_attention(x, wqkv, wp_heads, b_proj)
    out = jax.block_until_ready(out)

    ref = _reference(x, wq, wk, wv, w_proj, b_proj)
    assert out.shape == (B, T, C)
    # Tolerance loosened vs the f32 version: matmul inputs are bf16 (f32 accum).
    assert jnp.allclose(out, ref, atol=2e-2, rtol=2e-2), "mismatch vs reference"

    print("KERNEL_OK")
</pallas_src>

<mosaic_0001>
module attributes {stable_mosaic.version = 11 : i64} {
  func.func @_mha_fused_kernel(%arg0: i32, %arg1: i32, %arg2: memref<1x64x384xbf16, #tpu.memory_space<vmem>>, %arg3: memref<1x384x192xbf16, #tpu.memory_space<vmem>>, %arg4: memref<1x64x384xbf16, #tpu.memory_space<vmem>>, %arg5: memref<1x384xf32, #tpu.memory_space<vmem>>, %arg6: memref<1x64x384xf32, #tpu.memory_space<vmem>>, %arg7: memref<64x384xf32, #tpu.memory_space<vmem>>) attributes {dimension_semantics = [#tpu.dimension_semantics<parallel>, #tpu.dimension_semantics<arbitrary>], iteration_bounds = array<i64: 2, 6>, scalar_prefetch = 0 : i64, scratch_operands = 1 : i64, tpu.core_type = #tpu.core_type<tc>, window_params = [{transform_indices = @transform_0, window_bounds = array<i64: 1, 64, 384>}, {transform_indices = @transform_1, window_bounds = array<i64: 1, 384, 192>}, {transform_indices = @transform_2, window_bounds = array<i64: 1, 64, 384>}, {pipeline_mode = #tpu.pipeline_mode<synchronous>, transform_indices = @transform_3, window_bounds = array<i64: 1, 384>}, {transform_indices = @transform_4, window_bounds = array<i64: 1, 64, 384>}]} {
    %c0_i32 = arith.constant 0 : i32
    %0 = arith.cmpi eq, %arg1, %c0_i32 : i32
    %1 = arith.extui %0 : i1 to i32
    %c0_i32_0 = arith.constant 0 : i32
    %2 = arith.cmpi ne, %1, %c0_i32_0 : i32
    scf.if %2 {
      %cst_22 = arith.constant 0.000000e+00 : f32
      %45 = vector.broadcast %cst_22 : f32 to vector<64x384xf32>
      %c0_23 = arith.constant 0 : index
      %c0_24 = arith.constant 0 : index
      %46 = vector.load %arg7[%c0_23, %c0_24] : memref<64x384xf32, #tpu.memory_space<vmem>>, vector<64x384xf32>
      tpu.vector_store %arg7[%c0_23, %c0_24], %45 {strides = array<i32>} : memref<64x384xf32, #tpu.memory_space<vmem>>, vector<64x384xf32>,
    } else {
    }
    %c0 = arith.constant 0 : index
    %c0_1 = arith.constant 0 : index
    %c0_2 = arith.constant 0 : index
    %3 = vector.load %arg2[%c0, %c0_1, %c0_2] : memref<1x64x384xbf16, #tpu.memory_space<vmem>>, vector<1x64x384xbf16>
    %4 = vector.shape_cast %3 : vector<1x64x384xbf16> to vector<64x384xbf16>
    %c0_3 = arith.constant 0 : index
    %c0_4 = arith.constant 0 : index
    %c0_5 = arith.constant 0 : index
    %5 = vector.load %arg3[%c0_3, %c0_4, %c0_5] : memref<1x384x192xbf16, #tpu.memory_space<vmem>>, vector<1x384x192xbf16>
    %6 = vector.shape_cast %5 : vector<1x384x192xbf16> to vector<384x192xbf16>
    %cst = arith.constant dense<0.000000e+00> : vector<64x192xf32>
    %7 = tpu.matmul %4, %6, %cst {dimension_numbers = #tpu.dot_dimension_numbers<[1], [0], [0], [1], [0, 0, 1, 1], [], []>} : vector<64x384xbf16>, vector<384x192xbf16>, vector<64x192xf32> -> vector<64x192xf32>
    %8 = vector.extract_strided_slice %7 {offsets = [0, 0], sizes = [64, 64], strides = [1, 1]} : vector<64x192xf32> to vector<64x64xf32>
    %9 = vector.extract_strided_slice %7 {offsets = [0, 64], sizes = [64, 64], strides = [1, 1]} : vector<64x192xf32> to vector<64x64xf32>
    %10 = vector.extract_strided_slice %7 {offsets = [0, 128], sizes = [64, 64], strides = [1, 1]} : vector<64x192xf32> to vector<64x64xf32>
    %cst_6 = arith.constant 3.840000e+02 : f32
    %cst_7 = arith.constant -5.000000e-01 : f32
    %11 = math.powf %cst_6, %cst_7 : f32
    %12 = arith.truncf %8 : vector<64x64xf32> to vector<64x64xbf16>
    %13 = arith.truncf %9 : vector<64x64xf32> to vector<64x64xbf16>
    %cst_8 = arith.constant dense<0.000000e+00> : vector<64x64xf32>
    %14 = tpu.matmul %12, %13, %cst_8 {dimension_numbers = #tpu.dot_dimension_numbers<[1], [1], [0], [0], [0, 0, 1, 0], [], []>} : vector<64x64xbf16>, vector<64x64xbf16>, vector<64x64xf32> -> vector<64x64xf32>
    %15 = vector.broadcast %11 : f32 to vector<64x64xf32>
    %16 = arith.mulf %14, %15 : vector<64x64xf32>
    %17 = tpu.iota {dimensions = array<i32: 0>} : vector<64x64xi32>
    %18 = tpu.iota {dimensions = array<i32: 1>} : vector<64x64xi32>
    %19 = arith.cmpi sle, %18, %17 : vector<64x64xi32>
    %cst_9 = arith.constant 0xFF800000 : f32
    %20 = vector.broadcast %cst_9 : f32 to vector<64x64xf32>
    %21 = arith.select %19, %16, %20 : vector<64x64xi1>, vector<64x64xf32>
    %cst_10 = arith.constant dense<0xFF800000> : vector<64xf32>
    %22 = vector.multi_reduction <maximumf>, %21, %cst_10 [1] : vector<64x64xf32> to vector<64xf32>
    %23 = vector.shape_cast %22 : vector<64xf32> to vector<64x1xf32>
    %24 = vector.broadcast %23 : vector<64x1xf32> to vector<64x64xf32>
    %25 = arith.subf %21, %24 : vector<64x64xf32>
    %26 = math.exp %25 : vector<64x64xf32>
    %cst_11 = arith.constant dense<0.000000e+00> : vector<64xf32>
    %27 = vector.multi_reduction <add>, %26, %cst_11 [1] : vector<64x64xf32> to vector<64xf32>
    %28 = vector.shape_cast %27 : vector<64xf32> to vector<64x1xf32>
    %29 = tpu.reciprocal %28 {approx = true} : vector<64x1xf32> -> vector<64x1xf32>
    %30 = vector.broadcast %29 : vector<64x1xf32> to vector<64x64xf32>
    %31 = arith.mulf %26, %30 : vector<64x64xf32>
    %32 = arith.truncf %31 : vector<64x64xf32> to vector<64x64xbf16>
    %33 = arith.truncf %10 : vector<64x64xf32> to vector<64x64xbf16>
    %cst_12 = arith.constant dense<0.000000e+00> : vector<64x64xf32>
    %34 = tpu.matmul %32, %33, %cst_12 {dimension_numbers = #tpu.dot_dimension_numbers<[1], [0], [0], [1], [0, 0, 1, 1], [], []>} : vector<64x64xbf16>, vector<64x64xbf16>, vector<64x64xf32> -> vector<64x64xf32>
    %c0_13 = arith.constant 0 : index
    %c0_14 = arith.constant 0 : index
    %35 = vector.load %arg7[%c0_13, %c0_14] : memref<64x384xf32, #tpu.memory_space<vmem>>, vector<64x384xf32>
    %36 = arith.truncf %34 : vector<64x64xf32> to vector<64x64xbf16>
    %c0_15 = arith.constant 0 : index
    %c0_16 = arith.constant 0 : index
    %c0_17 = arith.constant 0 : index
    %37 = vector.load %arg4[%c0_15, %c0_16, %c0_17] : memref<1x64x384xbf16, #tpu.memory_space<vmem>>, vector<1x64x384xbf16>
    %38 = vector.shape_cast %37 : vector<1x64x384xbf16> to vector<64x384xbf16>
    %cst_18 = arith.constant dense<0.000000e+00> : vector<64x384xf32>
    %39 = tpu.matmul %36, %38, %cst_18 {dimension_numbers = #tpu.dot_dimension_numbers<[1], [0], [0], [1], [0, 0, 1, 1], [], []>} : vector<64x64xbf16>, vector<64x384xbf16>, vector<64x384xf32> -> vector<64x384xf32>
    %40 = arith.addf %35, %39 : vector<64x384xf32>
    %c0_19 = arith.constant 0 : index
    %c0_20 = arith.constant 0 : index
    %41 = vector.load %arg7[%c0_19, %c0_20] : memref<64x384xf32, #tpu.memory_space<vmem>>, vector<64x384xf32>
    tpu.vector_store %arg7[%c0_19, %c0_20], %40 {strides = array<i32>} : memref<64x384xf32, #tpu.memory_space<vmem>>, vector<64x384xf32>,
    %c5_i32 = arith.constant 5 : i32
    %42 = arith.cmpi eq, %arg1, %c5_i32 : i32
    %43 = arith.extui %42 : i1 to i32
    %c0_i32_21 = arith.constant 0 : i32
    %44 = arith.cmpi ne, %43, %c0_i32_21 : i32
    scf.if %44 {
      %c0_22 = arith.constant 0 : index
      %c0_23 = arith.constant 0 : index
      %45 = vector.load %arg7[%c0_22, %c0_23] : memref<64x384xf32, #tpu.memory_space<vmem>>, vector<64x384xf32>
      %c0_24 = arith.constant 0 : index
      %c0_25 = arith.constant 0 : index
      %46 = vector.load %arg5[%c0_24, %c0_25] : memref<1x384xf32, #tpu.memory_space<vmem>>, vector<1x384xf32>
      %47 = vector.broadcast %46 : vector<1x384xf32> to vector<64x384xf32>
      %48 = arith.addf %45, %47 : vector<64x384xf32>
      %c0_26 = arith.constant 0 : index
      %c0_27 = arith.constant 0 : index
      %c0_28 = arith.constant 0 : index
      %49 = vector.load %arg6[%c0_26, %c0_27, %c0_28] : memref<1x64x384xf32, #tpu.memory_space<vmem>>, vector<1x64x384xf32>
      %50 = vector.shape_cast %49 : vector<1x64x384xf32> to vector<64x384xf32>
      %51 = vector.shape_cast %48 : vector<64x384xf32> to vector<1x64x384xf32>
      tpu.vector_store %arg6[%c0_26, %c0_27, %c0_28], %51 {strides = array<i32>} : memref<1x64x384xf32, #tpu.memory_space<vmem>>, vector<1x64x384xf32>,
    } else {
    }
    return
  }
  func.func @transform_0(%arg0: i32, %arg1: i32) -> (i32, i32, i32) {
    %c0_i32 = arith.constant 0 : i32
    %c0_i32_0 = arith.constant 0 : i32
    %c0_i32_1 = arith.constant 0 : i32
    return %arg0, %c0_i32, %c0_i32_0 : i32, i32, i32
  }
  func.func @transform_1(%arg0: i32, %arg1: i32) -> (i32, i32, i32) {
    %c0_i32 = arith.constant 0 : i32
    %c0_i32_0 = arith.constant 0 : i32
    %c0_i32_1 = arith.constant 0 : i32
    return %arg1, %c0_i32, %c0_i32_0 : i32, i32, i32
  }
  func.func @transform_2(%arg0: i32, %arg1: i32) -> (i32, i32, i32) {
    %c0_i32 = arith.constant 0 : i32
    %c0_i32_0 = arith.constant 0 : i32
    %c0_i32_1 = arith.constant 0 : i32
    return %arg1, %c0_i32, %c0_i32_0 : i32, i32, i32
  }
  func.func @transform_3(%arg0: i32, %arg1: i32) -> (i32, i32) {
    %c0_i32 = arith.constant 0 : i32
    %c0_i32_0 = arith.constant 0 : i32
    %c0_i32_1 = arith.constant 0 : i32
    return %c0_i32, %c0_i32_0 : i32, i32
  }
  func.func @transform_4(%arg0: i32, %arg1: i32) -> (i32, i32, i32) {
    %c0_i32 = arith.constant 0 : i32
    %c0_i32_0 = arith.constant 0 : i32
    %c0_i32_1 = arith.constant 0 : i32
    return %arg0, %c0_i32, %c0_i32_0 : i32, i32, i32
  }
}

</mosaic_0001>

<bundles_post_ra>
// kernel: tpu_custom_call.1
= control target key start
LH: loop header
LB: loop body
LE: loop exit
PB: predicated region body
PF: predicated region fallthrough
CT: control target
= control target key end

     0   :  { %9 = vsyncpa [#allocation4], 0  ;;  %s2470_s0 = inlined_call_operand.vmem [shape: bf16[2,64,384], index: 0, kind: input, shape index: {}]   ;;  %s2471_s1 = inlined_call_operand.vmem [shape: bf16[6,384,192], index: 1, kind: input, shape index: {}]   ;;  %s2472_s2 = inlined_call_operand.vmem [shape: bf16[6,64,384], index: 2, kind: input, shape index: {}]   ;;  %s2473_s3 = inlined_call_operand.vmem [shape: f32[1,384], index: 3, kind: input, shape index: {}]   ;;  %s2474_s4 = inlined_call_operand.hbm [shape: f32[2,64,384], index: 4, kind: output, shape index: {}]  }
   0x1   :  { %11 = vsyncpa [#allocation4 + $0x1], 0  ;;  %s2152_s15 = smov 0   ;;  %s2154_s16 = smov 0  }
   0x2   :  { %s2156_s17 = smov 0   ;;  %s2158_s18 = smov 0  }
   0x3   :  { %s2160_s19 = smov 0   ;;  %s2162_s20 = smov 0  }
   0x4   :  { %s2164_s21 = smov 0   ;;  %s2166_s22 = smov 0  }
   0x5 LB: > { %2478 = sst [smem:[#allocation6_spill]] %s2115_s21  ;;  %s1615_s23 = sadd.s32 4294967295, %s2119_s22   ;;  %s2119_s22 = sphi %s2166_s22, %s17_s22   ;;  %s2115_s21 = sphi %s2164_s21, %s2486_s21   ;;  %s2111_s20 = sphi %s2162_s20, %s2491_s20   ;;  %s2107_s19 = sphi %s2160_s19, %s2484_s19   ;;  %s2103_s18 = sphi %s2158_s18, %s2490_s18   ;;  %s2099_s17 = sphi %s2156_s17, %s2489_s17   ;;  %s2095_s16 = sphi %s2154_s16, %s2488_s16   ;;  %s2091_s15 = sphi %s2152_s15, %s2487_s15  }
   0x6   : > { %s1616_s24 = sadd.s32 4294967294, %s2119_s22   ;;  %s26_s25 = sadd.s32 1, %s2111_s20 }
   0x7   : > { %p27_p0 = scmp.ge.s32.totalorder %s26_s25, 6  ;;  %s29_s26 = sadd.s32 1, %s2115_s21 }
   0x8   : > { %p145_p1 = scmp.ne.s32.totalorder %s2099_s17, %s2095_s16  ;;  %p146_p2 = scmp.eq.s32.totalorder %s1615_s23, 11 }
   0x9   : > { %s2493_s25 = smov (%p27_p0, %s26_s25), 0  ;;  %s2495_s26 = smov (!%p27_p0, %s29_s26), %s2115_s21 }
   0xa   : > { %2479 = sst [smem:[#allocation7_spill]] %s2493_s25  ;;  %p2201_p3 = por %p146_p2, %p145_p1 }
   0xb   : > { %p151_p4 = scmp.ne.s32.totalorder %s2095_s16, %s2091_s15  ;;  %p31_p5 = scmp.ge.s32.totalorder %s2495_s26, 2 }
   0xc   : > { %p152_p6 = scmp.eq.s32.totalorder %s1616_s24, 11  ;;  %p1619_p7 = scmp.ge.s32.totalorder %s2119_s22, 1 }
   0xd   : > { %p197_p8 = scmp.lt.s32.totalorder %s2119_s22, 13  ;;  %s2497_s26 = smov (%p31_p5, %s2495_s26), 0 }
   0xe   : > { %2481 = sst [smem:[#allocation8_spill]] %s2497_s26  ;;  %p2211_p9 = por %p152_p6, %p151_p4 }
   0xf   : > { %p198_p10 = pnand %p1619_p7, %p197_p8  ;;  %s132_s29 = ssub.s32 %s2115_s21, %s2497_s26 }
  0x10   : > { %s135_s30 = sadd.s32 1, %s2099_s17  ;;  %p133_p11 = scmp.eq.s32.totalorder %s132_s29, 0 }
  0x11   : > { %201 = sbr.rel (%p198_p10) target bundleno = 1550 (0x60e), region = 36  ;;  %s2476_s6 = sand.u32 (!%p198_p10), 1, %s2095_s16  }
  0x12   : > { %s2219_s5 = scalar_select %p133_p11, %s2099_s17, %s135_s30  }
  0x13   : > { %p233_p12 = scmp.lt.s32.totalorder (!%p198_p10), %s2107_s19, 1  ;;  %s1808_s7 = smul.u32 (!%p198_p10), 192, %s2476_s6 }
  0x14   : > { %p238_p13 = scmp.lt.s32.totalorder (!%p198_p10), %s2103_s18, 5  ;;  %p1623_p0 = scmp.ne.s32.totalorder (!%p198_p10), %s2103_s18, 0 }
  0x15   : > { %s2243_s21 = scalar_lea.vmem (!%p198_p10), [#allocation3], %s1808_s7 }
  0x18   : > { %s234_s8 = scalar_select %p233_p12, %s2107_s19, 1 }
  0x19   : > { %s239_s10 = scalar_select %p238_p13, %s2103_s18, 5 }
  0x1a   : > { %s1809_s9 = smul.u32 96, %s234_s8  ;;  %v2121_v0 = vmov (!%p1623_p0), 0.0  }
  0x1b   : > { %s1810_s14 = smul.u32 384, %s239_s10  ;;  %253 = vst [vmem:[#allocation2] sm:$0xff] (!%p1623_p0), %v2121_v0  ;;  %254 = vst [vmem:[#allocation2 + $0x8] sm:$0xff] (!%p1623_p0), %v2121_v0 }
  0x1c   : > { %s2231_s13 = scalar_lea.vmem %s2470_s0, %s1809_s9  ;;  %s1811_s23 = smul.u32 96, %s239_s10  ;;  %255 = vst [vmem:[#allocation2 + $0x10] sm:$0xff] (!%p1623_p0), %v2121_v0  ;;  %256 = vst [vmem:[#allocation2 + $0x18] sm:$0xff] (!%p1623_p0), %v2121_v0 }
  0x1d   : > { %s2236_s30 = scalar_lea.vmem %s2471_s1, %s1810_s14  ;;  %252 = sbr.rel (%p1623_p0) target bundleno = 39 (0x27), region = 40  ;;  %257 = vst [vmem:[#allocation2 + $0x20] sm:$0xff] (!%p1623_p0), %v2121_v0  ;;  %258 = vst [vmem:[#allocation2 + $0x28] sm:$0xff] (!%p1623_p0), %v2121_v0 }
  0x1e   : > { %s2241_s6 = scalar_lea.vmem %s2472_s2, %s1811_s23  ;;  %259 = vst [vmem:[#allocation2 + $0x30] sm:$0xff] (!%p1623_p0), %v2121_v0  ;;  %260 = vst [vmem:[#allocation2 + $0x38] sm:$0xff] (!%p1623_p0), %v2121_v0 }
  0x1f   : > { %261 = vst [vmem:[#allocation2 + $0x40] sm:$0xff] (!%p1623_p0), %v2121_v0  ;;  %262 = vst [vmem:[#allocation2 + $0x48] sm:$0xff] (!%p1623_p0), %v2121_v0 }
  0x20   : > { %263 = vst [vmem:[#allocation2 + $0x50] sm:$0xff] (!%p1623_p0), %v2121_v0  ;;  %264 = vst [vmem:[#allocation2 + $0x58] sm:$0xff] (!%p1623_p0), %v2121_v0 }
  0x21   : > { %265 = vst [vmem:[#allocation2 + $0x60] sm:$0xff] (!%p1623_p0), %v2121_v0  ;;  %266 = vst [vmem:[#allocation2 + $0x68] sm:$0xff] (!%p1623_p0), %v2121_v0 }
  0x22   : > { %267 = vst [vmem:[#allocation2 + $0x70] sm:$0xff] (!%p1623_p0), %v2121_v0  ;;  %268 = vst [vmem:[#allocation2 + $0x78] sm:$0xff] (!%p1623_p0), %v2121_v0 }
  0x23   : > { %269 = vst [vmem:[#allocation2 + $0x80] sm:$0xff] (!%p1623_p0), %v2121_v0  ;;  %270 = vst [vmem:[#allocation2 + $0x88] sm:$0xff] (!%p1623_p0), %v2121_v0 }
  0x24   : > { %271 = vst [vmem:[#allocation2 + $0x90] sm:$0xff] %v2121_v0  ;;  %272 = vst [vmem:[#allocation2 + $0x98] sm:$0xff] %v2121_v0 }
  0x25   : > { %273 = vst [vmem:[#allocation2 + $0xa0] sm:$0xff] %v2121_v0  ;;  %274 = vst [vmem:[#allocation2 + $0xa8] sm:$0xff] %v2121_v0 }
  0x26   : > { %275 = vst [vmem:[#allocation2 + $0xb0] sm:$0xff] %v2121_v0  ;;  %276 = vst [vmem:[#allocation2 + $0xb8] sm:$0xff] %v2121_v0 }
  0x27 PF: > { %v1889_v1 = vld [vmem:[%s2236_s30 + $0x4] ss:$8 sps:$4 sm:$0xff]   ;;  %v1891_v2 = vld [vmem:[%s2236_s30] ss:$8 sps:$4 sm:$0xff]   ;;  %v1892_v3 = vld [vmem:[%s2236_s30 + $0x14] ss:$8 sps:$4 sm:$0xff]  }
  0x28   : > { %645 = vmatprep.subr.bf16.mxu0 %v1889_v1  ;;  %v1894_v4 = vld [vmem:[%s2236_s30 + $0x10] ss:$8 sps:$4 sm:$0xff]   ;;  %v1895_v5 = vld [vmem:[%s2236_s30 + $0x24] ss:$8 sps:$4 sm:$0xff]   ;;  %v1897_v6 = vld [vmem:[%s2236_s30 + $0x20] ss:$8 sps:$4 sm:$0xff]  }
  0x29   : > { %646 = vmatpush1.bf16.msra.mxu0 %v1891_v2  ;;  %v1898_v7 = vld [vmem:[%s2236_s30 + $0x34] ss:$8 sps:$4 sm:$0xff]   ;;  %v1900_v8 = vld [vmem:[%s2236_s30 + $0x30] ss:$8 sps:$4 sm:$0xff]   ;;  %v1901_v9 = vld [vmem:[%s2236_s30 + $0x44] ss:$8 sps:$4 sm:$0xff]  }
  0x2a   : > { %647 = vmatprep.subr.bf16.mxu0 %v1892_v3  ;;  %v1903_v10 = vld [vmem:[%s2236_s30 + $0x40] ss:$8 sps:$4 sm:$0xff]   ;;  %v1904_v11 = vld [vmem:[%s2236_s30 + $0x54] ss:$8 sps:$4 sm:$0xff]   ;;  %v1906_v12 = vld [vmem:[%s2236_s30 + $0x50] ss:$8 sps:$4 sm:$0xff]  }
  0x2b   : > { %v1907_v13 = vld [vmem:[%s2236_s30 + $0x64] ss:$8 sps:$4 sm:$0xff]   ;;  %v1909_v15 = vld [vmem:[%s2236_s30 + $0x60] ss:$8 sps:$4 sm:$0xff]   ;;  %v1910_v16 = vld [vmem:[%s2236_s30 + $0x74] ss:$8 sps:$4 sm:$0xff]  }
  0x2c   : > { %v1939_v14 = vld [vmem:[%s2231_s13 + $0x4] ss:$12 sps:$4 sm:$0xff]   ;;  %v1915_v19 = vld [vmem:[%s2236_s30 + $0x80] ss:$8 sps:$4 sm:$0xff]   ;;  %v1916_v20 = vld [vmem:[%s2236_s30 + $0x94] ss:$8 sps:$4 sm:$0xff]  }
  0x2d   : > { %648 = vmatpush1.bf16.msra.mxu0 %v1894_v4  ;;  %677 = vmatprep.mubr.bf16.mxu0 %v1939_v14  ;;  %v1912_v17 = vld [vmem:[%s2236_s30 + $0x70] ss:$8 sps:$4 sm:$0xff]   ;;  %v1913_v18 = vld [vmem:[%s2236_s30 + $0x84] ss:$8 sps:$4 sm:$0xff]   ;;  %v1921_v23 = vld [vmem:[%s2236_s30 + $0xa0] ss:$8 sps:$4 sm:$0xff]  }
  0x2e   : > { %649 = vmatprep.subr.bf16.mxu0 %v1895_v5  ;;  %v1918_v21 = vld [vmem:[%s2236_s30 + $0x90] ss:$8 sps:$4 sm:$0xff]   ;;  %v1919_v22 = vld [vmem:[%s2236_s30 + $0xa4] ss:$8 sps:$4 sm:$0xff]   ;;  %v1922_v24 = vld [vmem:[%s2236_s30 + $0xb4] ss:$8 sps:$4 sm:$0xff]  }
  0x2f   : > { %v1924_v25 = vld [vmem:[%s2236_s30 + $0xb0] ss:$8 sps:$4 sm:$0xff]   ;;  %v1925_v26 = vld [vmem:[%s2236_s30 + $0xc4] ss:$8 sps:$4 sm:$0xff]   ;;  %v1927_v27 = vld [vmem:[%s2236_s30 + $0xc0] ss:$8 sps:$4 sm:$0xff]  }
  0x30   : > { %v1928_v28 = vld [vmem:[%s2236_s30 + $0xd4] ss:$8 sps:$4 sm:$0xff]   ;;  %v1930_v29 = vld [vmem:[%s2236_s30 + $0xd0] ss:$8 sps:$4 sm:$0xff]   ;;  %v1931_v30 = vld [vmem:[%s2236_s30 + $0xe4] ss:$8 sps:$4 sm:$0xff]  }
  0x31   : > { %650 = vmatpush1.bf16.msra.mxu0 %v1897_v6  ;;  %v1933_v31 = vld [vmem:[%s2236_s30 + $0xe0] ss:$8 sps:$4 sm:$0xff]   ;;  %v1934_v32 = vld [vmem:[%s2236_s30 + $0xf4] ss:$8 sps:$4 sm:$0xff]   ;;  %v1936_v33 = vld [vmem:[%s2236_s30 + $0xf0] ss:$8 sps:$4 sm:$0xff]  }
  0x32   : > { %651 = vmatprep.subr.bf16.mxu0 %v1898_v7  ;;  %v1942_v34 = vld [vmem:[%s2236_s30 + $0x104] ss:$8 sps:$4 sm:$0xff]   ;;  %v1940_v36 = vld [vmem:[%s2236_s30 + $0x100] ss:$8 sps:$4 sm:$0xff]   ;;  %v1945_v38 = vld [vmem:[%s2236_s30 + $0x114] ss:$8 sps:$4 sm:$0xff]  }
  0x33   : > { %v1937_v35 = vld [vmem:[%s2231_s13] ss:$12 sps:$4 sm:$0xff]   ;;  %v1946_v37 = vld [vmem:[%s2231_s13 + $0x1c] ss:$12 sps:$4 sm:$0xff]   ;;  %v1943_v39 = vld [vmem:[%s2236_s30 + $0x110] ss:$8 sps:$4 sm:$0xff]  }
  0x34   : > { %v1951_v40 = vld [vmem:[%s2236_s30 + $0x124] ss:$8 sps:$4 sm:$0xff]   ;;  %v1949_v42 = vld [vmem:[%s2236_s30 + $0x120] ss:$8 sps:$4 sm:$0xff]   ;;  %v1954_v44 = vld [vmem:[%s2236_s30 + $0x134] ss:$8 sps:$4 sm:$0xff]  }
  0x35   : > { %652 = vmatpush1.bf16.msra.mxu0 %v1900_v8  ;;  %v1948_v41 = vld [vmem:[%s2231_s13 + $0x18] ss:$12 sps:$4 sm:$0xff]   ;;  %v1955_v43 = vld [vmem:[%s2231_s13 + $0x34] ss:$12 sps:$4 sm:$0xff]   ;;  %v1957_v47 = vld [vmem:[%s2231_s13 + $0x30] ss:$12 sps:$4 sm:$0xff]  }
  0x36   : > { %653 = vmatprep.subr.bf16.mxu0 %v1901_v9  ;;  %v1952_v45 = vld [vmem:[%s2236_s30 + $0x130] ss:$8 sps:$4 sm:$0xff]   ;;  %v1960_v46 = vld [vmem:[%s2236_s30 + $0x144] ss:$8 sps:$4 sm:$0xff]   ;;  %v1958_v48 = vld [vmem:[%s2236_s30 + $0x140] ss:$8 sps:$4 sm:$0xff]  }
  0x37   : > { %v1964_v49 = vld [vmem:[%s2231_s13 + $0x4c] ss:$12 sps:$4 sm:$0xff]   ;;  %v1963_v50 = vld [vmem:[%s2236_s30 + $0x154] ss:$8 sps:$4 sm:$0xff]   ;;  %v1967_v54 = vld [vmem:[%s2236_s30 + $0x160] ss:$8 sps:$4 sm:$0xff]  }
  0x38   : > { %v1961_v51 = vld [vmem:[%s2236_s30 + $0x150] ss:$8 sps:$4 sm:$0xff]   ;;  %v1969_v52 = vld [vmem:[%s2236_s30 + $0x164] ss:$8 sps:$4 sm:$0xff]   ;;  %v1966_v53 = vld [vmem:[%s2231_s13 + $0x48] ss:$12 sps:$4 sm:$0xff]  }
  0x39   : > { %654 = vmatpush1.bf16.msra.mxu0 %v1903_v10  ;;  %v1972_v55 = vld [vmem:[%s2236_s30 + $0x174] ss:$8 sps:$4 sm:$0xff]   ;;  %v1970_v56 = vld [vmem:[%s2236_s30 + $0x170] ss:$8 sps:$4 sm:$0xff]   ;;  %v2122_v57 = vmov 0   ;;  %vm807_vm0 = vcmask 523264  }
  0x3a   : > { %655 = vmatprep.subr.bf16.mxu0 %v1904_v11  ;;  %v1973_v58 = vld [vmem:[%s2231_s13 + $0x8] ss:$12 sps:$4 sm:$0xff]   ;;  %v1974_v59 = vld [vmem:[%s2231_s13 + $0x20] ss:$12 sps:$4 sm:$0xff]   ;;  %v1975_v60 = vld [vmem:[%s2231_s13 + $0x38] ss:$12 sps:$4 sm:$0xff]  }
  0x3b   : > { %v1976_v61 = vld [vmem:[%s2231_s13 + $0x50] ss:$12 sps:$4 sm:$0xff]   ;;  %s2123_s25 = smov 64   ;;  %p1712_p1 = scmp.ne.s32.totalorder %s2103_s18, 5 }
  0x3d   : > { %656 = vmatpush1.bf16.msra.mxu0 %v1906_v12 }
  0x3e   : > { %657 = vmatprep.subr.bf16.mxu0 %v1907_v13 }
  0x41   : > { %658 = vmatpush1.bf16.msra.mxu0 %v1909_v15 }
  0x42   : > { %659 = vmatprep.subr.bf16.mxu0 %v1910_v16 }
  0x45   : > { %660 = vmatpush1.bf16.msra.mxu0 %v1912_v17 }
  0x46   : > { %661 = vmatprep.subr.bf16.mxu0 %v1913_v18 }
  0x49   : > { %662 = vmatpush1.bf16.msra.mxu0 %v1915_v19 }
  0x4a   : > { %663 = vmatprep.subr.bf16.mxu0 %v1916_v20 }
  0x4d   : > { %664 = vmatpush1.bf16.msra.mxu0 %v1918_v21 }
  0x4e   : > { %665 = vmatprep.subr.bf16.mxu0 %v1919_v22 }
  0x51   : > { %666 = vmatpush1.bf16.msra.mxu0 %v1921_v23 }
  0x52   : > { %667 = vmatprep.subr.bf16.mxu0 %v1922_v24 }
  0x55   : > { %668 = vmatpush1.bf16.msra.mxu0 %v1924_v25 }
  0x56   : > { %669 = vmatprep.subr.bf16.mxu0 %v1925_v26 }
  0x59   : > { %670 = vmatpush1.bf16.msra.mxu0 %v1927_v27 }
  0x5a   : > { %671 = vmatprep.subr.bf16.mxu0 %v1928_v28 }
  0x5d   : > { %672 = vmatpush1.bf16.msra.mxu0 %v1930_v29 }
  0x5e   : > { %673 = vmatprep.subr.bf16.mxu0 %v1931_v30  ;;  %v905_v30 = vlaneseq }
  0x61   : > { %674 = vmatpush1.bf16.msra.mxu0 %v1933_v31  ;;  %v2322_v31 = vshrl.u32 %v905_v30, 7 }
  0x62   : > { %675 = vmatprep.subr.bf16.mxu0 %v1934_v32  ;;  %v915_v32 = vand.u32 127, %v905_v30 }
  0x64   : > { %vm916_vm1 = vcmp.le.s32.totalorder %v915_v32, %v2322_v31 }
  0x65   : > { %676 = vmatpush1.bf16.msra.mxu0 %v1936_v33  ;;  %v907_v33 = vadd.s32 8, %v2322_v31 }
  0x66   : > { %718 = vmatprep.subr.bf16.mxu0 %v1942_v34  ;;  %v908_v34 = vadd.s32 16, %v2322_v31 }
  0x67   : > { %vm917_vm2 = vcmp.le.s32.totalorder %v915_v32, %v907_v33 }
  0x68   : > { %678 = vmatmul.mubr.bf16.vlgmr.msra.gmra.mrb[0].mxu0 %v1937_v35  ;;  %vm918_vm3 = vcmp.le.s32.totalorder %v915_v32, %v908_v34 }
  0x69   : > { %719 = vmatpush1.bf16.msra.mxu0 %v1940_v36  ;;  %687 = vmatprep.mubr.bf16.mxu0 %v1946_v37 }
  0x6a   : > { %720 = vmatprep.subr.bf16.mxu0 %v1945_v38 }
  0x6d   : > { %721 = vmatpush1.bf16.msra.mxu0 %v1943_v39 }
  0x6e   : > { %722 = vmatprep.subr.bf16.mxu0 %v1951_v40 }
  0x70   : > { %688 = vmatmul.mubr.bf16.gmra.mrb[4].mxu0 %v1948_v41  ;;  %v909_v41 = vadd.s32 24, %v2322_v31 }
  0x71   : > { %723 = vmatpush1.bf16.msra.mxu0 %v1949_v42  ;;  %697 = vmatprep.mubr.bf16.mxu0 %v1955_v43 }
  0x72   : > { %724 = vmatprep.subr.bf16.mxu0 %v1954_v44  ;;  %vm919_vm4 = vcmp.le.s32.totalorder %v915_v32, %v909_v41 }
  0x75   : > { %725 = vmatpush1.bf16.msra.mxu0 %v1952_v45  ;;  %v910_v45 = vadd.s32 32, %v2322_v31 }
  0x76   : > { %726 = vmatprep.subr.bf16.mxu0 %v1960_v46 }
  0x77   : > { %vm920_vm5 = vcmp.le.s32.totalorder %v915_v32, %v910_v45 }
  0x78   : > { %698 = vmatmul.mubr.bf16.gmra.mrb[8].mxu0 %v1957_v47 }
  0x79   : > { %727 = vmatpush1.bf16.msra.mxu0 %v1958_v48  ;;  %707 = vmatprep.mubr.bf16.mxu0 %v1964_v49 }
  0x7a   : > { %728 = vmatprep.subr.bf16.mxu0 %v1963_v50  ;;  %v912_v50 = vadd.s32 48, %v2322_v31 }
  0x7c   : > { %vm922_vm6 = vcmp.le.s32.totalorder %v915_v32, %v912_v50  ;;  %v1979_v50 = vld [vmem:[%s2241_s6 + $0x4] ss:$12 sps:$4 sm:$0xff]  }
  0x7d   : > { %729 = vmatpush1.bf16.msra.mxu0 %v1961_v51  ;;  %v911_v51 = vadd.s32 40, %v2322_v31 }
  0x7e   : > { %730 = vmatprep.subr.bf16.mxu0 %v1969_v52 }
  0x7f   : > { %vm921_vm7 = vcmp.le.s32.totalorder %v915_v32, %v911_v51 }
  0x80   : > { %708 = vmatmul.mubr.bf16.gmra.mrb[12].mxu0 %v1966_v53 }
  0x81   : > { %731 = vmatpush1.bf16.msra.mxu0 %v1967_v54  ;;  %750 = vmatprep.mubr.bf16.mxu0 %v2122_v57 }
  0x82   : > { %732 = vmatprep.subr.bf16.mxu0 %v1972_v55 }
  0x85   : > { %733 = vmatpush1.bf16.msra.mxu0 %v1970_v56 }
  0x88   : > { %751 = vmatmul.mubr.bf16.vlgmr.msra.gmra.mrb[0].mxu0 %v1973_v58 }
  0x89   : > { %760 = vmatprep.mubr.bf16.mxu0 %v2122_v57 }
  0x90   : > { %761 = vmatmul.mubr.bf16.gmra.mrb[4].mxu0 %v1974_v59 }
  0x91   : > { %770 = vmatprep.mubr.bf16.mxu0 %v2122_v57 }
  0x98   : > { %771 = vmatmul.mubr.bf16.gmra.mrb[8].mxu0 %v1975_v60 }
  0x99   : > { %780 = vmatprep.mubr.bf16.mxu0 %v2122_v57 }
  0xa0   : > { %781 = vmatmul.mubr.bf16.gmra.mrb[12].mxu0 %v1976_v61  ;;  %v913_v61 = vadd.s32 56, %v2322_v31 }
  0xa2   : > { %vm923_vm8 = vcmp.le.s32.totalorder %v915_v32, %v913_v61 }
 0x15b   : > { %v752_v62 = vpop.f32.mrb[0].mxu0 }
 0x15c   : > { %v754_v63 = vpop.f32.mrb[1].mxu0 }
 0x15d   : > { %v756_v0 = vpop.f32.mrb[2].mxu0 }
 0x15e   : > { %v791_v1 = vpack.c.bf16 %v756_v0, %v752_v62  ;;  %v758_v2 = vpop.f32.mrb[3].mxu0 }
 0x15f   : > { %v1024_v3 = vpack.c.bf16 %v758_v2, %v754_v63 }
 0x160   : > { %799 = vrot.lane.b32.xlu0 %v791_v1, %s2123_s25  ;;  %1748 = vmatprep.mubr.msk.bf16.mxu1 %vm807_vm0, %v791_v1 }
 0x163   : > { %v762_v4 = vpop.f32.mrb[4].mxu0 }
 0x164   : > { %v764_v5 = vpop.f32.mrb[5].mxu0 }
 0x165   : > { %v766_v6 = vpop.f32.mrb[6].mxu0 }
 0x166   : > { %v792_v7 = vpack.c.bf16 %v766_v6, %v762_v4  ;;  %v768_v8 = vpop.f32.mrb[7].mxu0 }
 0x167   : > { %v1025_v9 = vpack.c.bf16 %v768_v8, %v764_v5 }
 0x168   : > { %801 = vrot.lane.b32.xlu0 %v792_v7, %s2123_s25 }
 0x16b   : > { %v772_v10 = vpop.f32.mrb[8].mxu0 }
 0x16c   : > { %v774_v11 = vpop.f32.mrb[9].mxu0 }
 0x16d   : > { %v776_v12 = vpop.f32.mrb[10].mxu0 }
 0x16e   : > { %v793_v13 = vpack.c.bf16 %v776_v12, %v772_v10  ;;  %v778_v14 = vpop.f32.mrb[11].mxu0 }
 0x16f   : > { %v1026_v15 = vpack.c.bf16 %v778_v14, %v774_v11 }
 0x170   : > { %803 = vrot.lane.b32.xlu1 %v793_v13, %s2123_s25 }
 0x173   : > { %v782_v16 = vpop.f32.mrb[12].mxu0 }
 0x174   : > { %v784_v17 = vpop.f32.mrb[13].mxu0 }
 0x175   : > { %v786_v18 = vpop.f32.mrb[14].mxu0 }
 0x176   : > { %v794_v19 = vpack.c.bf16 %v786_v18, %v782_v16  ;;  %v788_v20 = vpop.f32.mrb[15].mxu0 }
 0x177   : > { %v1027_v21 = vpack.c.bf16 %v788_v20, %v784_v17 }
 0x178   : > { %805 = vrot.lane.b32.xlu1 %v794_v19, %s2123_s25 }
 0x1d2   : > { %v800_v22 = vpop.permute.xlu0 %799 }
 0x1d3   : > { %1804 = vmatprep.subr.msk.bf16.mxu1 %vm807_vm0, %v800_v22  ;;  %v821_v23 = vsel %vm807_vm0, %v800_v22, 0 }
 0x1d4   : > { %1741 = vmatpush3.bf16.xpose.msra.mxu1 %v821_v23 }
 0x1da   : > { %v802_v24 = vpop.permute.xlu0 %801 }
 0x1db   : > { %1805 = vmatprep.subr.msk.bf16.mxu1 %vm807_vm0, %v802_v24  ;;  %v824_v25 = vsel %vm807_vm0, %v802_v24, 0 }
 0x1dc   : > { %1743 = vmatpush3.bf16.xpose.msra.mxu1 %v824_v25 }
 0x1e2   : > { %v804_v26 = vpop.permute.xlu1 %803 }
 0x1e3   : > { %1806 = vmatprep.subr.msk.bf16.mxu1 %vm807_vm0, %v804_v26  ;;  %v827_v27 = vsel %vm807_vm0, %v804_v26, 0 }
 0x1e4   : > { %1745 = vmatpush3.bf16.xpose.msra.mxu1 %v827_v27 }
 0x1ea   : > { %v806_v28 = vpop.permute.xlu1 %805 }
 0x1eb   : > { %1807 = vmatprep.subr.msk.bf16.mxu1 %vm807_vm0, %v806_v28  ;;  %v830_v29 = vsel %vm807_vm0, %v806_v28, 0 }
 0x1ec   : > { %1747 = vmatpush3.bf16.xpose.msra.mxu1 %v830_v29 }
 0x1ed   : > { %1756 = vmatprep.subr.bf16.mxu1 %v1024_v3 }
 0x1f3   : > { %1749 = vmatmul.mubr.msk.bf16.vlgmr.msra.gmra.mrb[0].mxu1 %vm807_vm0, %v792_v7 }
 0x1f4   : > { %1752 = vmatprep.mubr.msk.bf16.mxu1 %vm807_vm0, %v793_v13  ;;  %1757 = vmatpush3.bf16.msra.mxu1 %v1024_v3 }
 0x1f5   : > { %1758 = vmatprep.subr.bf16.mxu1 %v1025_v9 }
 0x1f8   : > { %1759 = vmatpush3.bf16.msra.mxu1 %v1025_v9 }
 0x1f9   : > { %1760 = vmatprep.subr.bf16.mxu1 %v1026_v15 }
 0x1fb   : > { %1753 = vmatmul.mubr.msk.bf16.gmra.mrb[4].mxu1 %vm807_vm0, %v794_v19 }
 0x1fc   : > { %1761 = vmatpush3.bf16.msra.mxu1 %v1026_v15 }
 0x1fd   : > { %1762 = vmatprep.subr.bf16.mxu1 %v1027_v21 }
 0x200   : > { %1763 = vmatpush3.bf16.msra.mxu1 %v1027_v21 }
 0x201   : > { %1225 = vmatprep.subr.bf16.mxu1 %v1979_v50 }
 0x2c6   : > { %v1750_v35 = vpop.f32.mrb[0].mxu1 }
 0x2c7   : > { %v866_v36 = vpop.f32.mrb[1].mxu1  ;;  %v899_v37 = vmul.f32 0.05103104, %v1750_v35 }
 0x2c8   : > { %v897_v38 = vmul.f32 0.05103104, %v866_v36  ;;  %v1751_v39 = vpop.f32.mrb[2].mxu1 }
 0x2c9   : > { %v869_v40 = vpop.f32.mrb[3].mxu1  ;;  %v900_v46 = vmul.f32 0.05103104, %v1751_v39  ;;  %v926_v48 = vsel %vm918_vm3, %v899_v37, -inf }
 0x2ca   : > { %v898_v42 = vmul.f32 0.05103104, %v869_v40  ;;  %v924_v43 = vsel %vm916_vm1, %v897_v38, -inf  ;;  %v938_v54 = vsel %vm807_vm0, %v926_v48, -inf }
 0x2cb   : > { %v932_v44 = vsel %vm807_vm0, %v924_v43, -inf  ;;  %v927_v59 = vsel %vm919_vm4, %v900_v46, -inf }
 0x2cc   : > { %933 = vmax.xlane.f32.xlu0 %v932_v44  ;;  %v925_v47 = vsel %vm917_vm2, %v898_v42, -inf  ;;  %v941_v0 = vsel %vm807_vm0, %v927_v59, -inf }
 0x2cd   : > { %v935_v49 = vsel %vm807_vm0, %v925_v47, -inf }
 0x2ce   : > { %936 = vmax.xlane.f32.xlu1 %v935_v49  ;;  %v1754_v52 = vpop.f32.mrb[4].mxu1 }
 0x2cf   : > { %v882_v53 = vpop.f32.mrb[5].mxu1  ;;  %v903_v55 = vmul.f32 0.05103104, %v1754_v52 }
 0x2d0   : > { %v901_v56 = vmul.f32 0.05103104, %v882_v53  ;;  %939 = vmax.xlane.f32.xlu0 %v938_v54  ;;  %v1755_v58 = vpop.f32.mrb[6].mxu1 }
 0x2d1   : > { %v885_v60 = vpop.f32.mrb[7].mxu1  ;;  %v904_v2 = vmul.f32 0.05103104, %v1755_v58  ;;  %v930_v3 = vsel %vm922_vm6, %v903_v55, -inf }
 0x2d2   : > { %v902_v62 = vmul.f32 0.05103104, %v885_v60  ;;  %v928_v63 = vsel %vm920_vm5, %v901_v56, -inf  ;;  %v950_v5 = vsel %vm807_vm0, %v930_v3, -inf }
 0x2d3   : > { %v944_v1 = vsel %vm807_vm0, %v928_v63, -inf  ;;  %v931_v7 = vsel %vm923_vm8, %v904_v2, -inf }
 0x2d4   : > { %942 = vmax.xlane.f32.xlu0 %v941_v0  ;;  %945 = vmax.xlane.f32.xlu1 %v944_v1  ;;  %v929_v4 = vsel %vm921_vm7, %v902_v62, -inf  ;;  %v953_v8 = vsel %vm807_vm0, %v931_v7, -inf }
 0x2d5   : > { %v947_v6 = vsel %vm807_vm0, %v929_v4, -inf }
 0x2d8   : > { %951 = vmax.xlane.f32.xlu1 %v950_v5  ;;  %948 = vmax.xlane.f32.xlu0 %v947_v6  ;;  %v1977_v5 = vld [vmem:[%s2241_s6] ss:$12 sps:$4 sm:$0xff]  }
 0x2dc   : > { %954 = vmax.xlane.f32.xlu0 %v953_v8 }
 0x359   : > { %v934_v9 = vpop.xlane.xlu0 %933 }
 0x35a   : > { %v956_v10 = vsub.f32 %v924_v43, %v934_v9 }
 0x35b   : > { %v937_v11 = vpop.xlane.xlu1 %936 }
 0x35c   : > { %v964_v12 = vmul.f32 1.442695, %v956_v10  ;;  %v957_v13 = vsub.f32 %v925_v47, %v937_v11  ;;  %v1980_v10 = vld [vmem:[%s2241_s6 + $0x18] ss:$12 sps:$4 sm:$0xff]  }
 0x35d   : > { %v940_v14 = vpop.xlane.xlu0 %939 }
 0x35e   : > { %1993 = vpow2.f32 %v964_v12  ;;  %v966_v15 = vmul.f32 1.442695, %v957_v13  ;;  %v958_v16 = vsub.f32 %v926_v48, %v940_v14  ;;  %v1985_v14 = vld [vmem:[%s2241_s6 + $0x34] ss:$12 sps:$4 sm:$0xff]  }
 0x360   : > { %1995 = vpow2.f32 %v966_v15  ;;  %v968_v17 = vmul.f32 1.442695, %v958_v16 }
 0x361   : > { %v943_v18 = vpop.xlane.xlu0 %942  ;;  %v946_v19 = vpop.xlane.xlu1 %945 }
 0x362   : > { %1997 = vpow2.f32 %v968_v17  ;;  %v959_v20 = vsub.f32 %v927_v59, %v943_v18  ;;  %v960_v21 = vsub.f32 %v928_v63, %v946_v19  ;;  %v1983_v19 = vld [vmem:[%s2241_s6 + $0x30] ss:$12 sps:$4 sm:$0xff]  }
 0x364   : > { %v970_v22 = vmul.f32 1.442695, %v959_v20  ;;  %v972_v23 = vmul.f32 1.442695, %v960_v21  ;;  %v1988_v21 = vld [vmem:[%s2241_s6 + $0x4c] ss:$12 sps:$4 sm:$0xff]  }
 0x365   : > { %v952_v24 = vpop.xlane.xlu1 %951  ;;  %v949_v25 = vpop.xlane.xlu0 %948 }
 0x366   : > { %1999 = vpow2.f32 %v970_v22  ;;  %v962_v26 = vsub.f32 %v930_v3, %v952_v24  ;;  %v961_v27 = vsub.f32 %v929_v4, %v949_v25  ;;  %v1986_v22 = vld [vmem:[%s2241_s6 + $0x48] ss:$12 sps:$4 sm:$0xff]  }
 0x367   : > { %2001 = vpow2.f32 %v972_v23  ;;  %v1989_v23 = vld [vmem:[%s2241_s6 + $0x8] ss:$12 sps:$4 sm:$0xff]  }
 0x368   : > { %v1994_v28 = vpop.eup %1993  ;;  %v976_v29 = vmul.f32 1.442695, %v962_v26  ;;  %v974_v30 = vmul.f32 1.442695, %v961_v27 }
 0x369   : > { %v955_v32 = vpop.xlane.xlu0 %954  ;;  %v980_v33 = vsel %vm807_vm0, %v1994_v28, 0.0 }
 0x36a   : > { %v1996_v34 = vpop.eup %1995  ;;  %2003 = vpow2.f32 %v976_v29  ;;  %v963_v35 = vsub.f32 %v931_v7, %v955_v32  ;;  %981 = vadd.xlane.f32.xlu1 %v980_v33  ;;  %v1982_v7 = vld [vmem:[%s2241_s6 + $0x1c] ss:$12 sps:$4 sm:$0xff]   ;;  %v1991_v32 = vld [vmem:[%s2241_s6 + $0x38] ss:$12 sps:$4 sm:$0xff]  }
 0x36b   : > { %2005 = vpow2.f32 %v974_v30  ;;  %v983_v36 = vsel %vm807_vm0, %v1996_v34, 0.0  ;;  %v1990_v30 = vld [vmem:[%s2241_s6 + $0x20] ss:$12 sps:$4 sm:$0xff]  }
 0x36c   : > { %v1998_v37 = vpop.eup %1997  ;;  %v978_v38 = vmul.f32 1.442695, %v963_v35  ;;  %984 = vadd.xlane.f32.xlu0 %v983_v36 }
 0x36d   : > { %v986_v39 = vsel %vm807_vm0, %v1998_v37, 0.0 }
 0x36e   : > { %2007 = vpow2.f32 %v978_v38  ;;  %987 = vadd.xlane.f32.xlu1 %v986_v39  ;;  %v1992_v38 = vld [vmem:[%s2241_s6 + $0x50] ss:$12 sps:$4 sm:$0xff]  }
 0x370   : > { %v2000_v40 = vpop.eup %1999 }
 0x371   : > { %v2002_v41 = vpop.eup %2001  ;;  %v989_v42 = vsel %vm807_vm0, %v2000_v40, 0.0 }
 0x372   : > { %v992_v43 = vsel %vm807_vm0, %v2002_v41, 0.0  ;;  %990 = vadd.xlane.f32.xlu0 %v989_v42 }
 0x373   : > { %993 = vadd.xlane.f32.xlu1 %v992_v43  ;;  %v1108_v43 = vld [vmem:[#allocation2 + $0x18] sm:$0xff] }
 0x374   : > { %v2004_v44 = vpop.eup %2003 }
 0x375   : > { %v2006_v45 = vpop.eup %2005  ;;  %v998_v46 = vsel %vm807_vm0, %v2004_v44, 0.0 }
 0x376   : > { %v995_v47 = vsel %vm807_vm0, %v2006_v45, 0.0 }
 0x377   : > { %999 = vadd.xlane.f32.xlu1 %v998_v46  ;;  %996 = vadd.xlane.f32.xlu0 %v995_v47  ;;  %v1109_v46 = vld [vmem:[#allocation2 + $0x20] sm:$0xff] }
 0x378   : > { %v2008_v48 = vpop.eup %2007 }
 0x379   : > { %v1001_v49 = vsel %vm807_vm0, %v2008_v48, 0.0 }
 0x37b   : > { %1002 = vadd.xlane.f32.xlu0 %v1001_v49 }
 0x3f7   : > { %v982_v51 = vpop.xlane.xlu1 %981 }
 0x3f8   : > { %2009 = vrcp.f32 %v982_v51  ;;  %v1111_v51 = vld [vmem:[#allocation2 + $0x30] sm:$0xff] }
 0x3f9   : > { %v985_v52 = vpop.xlane.xlu0 %984 }
 0x3fa   : > { %2011 = vrcp.f32 %v985_v52  ;;  %v1112_v52 = vld [vmem:[#allocation2 + $0x38] sm:$0xff] }
 0x3fb   : > { %v988_v53 = vpop.xlane.xlu1 %987 }
 0x3fc   : > { %2013 = vrcp.f32 %v988_v53 }
 0x3ff   : > { %v991_v54 = vpop.xlane.xlu0 %990 }
 0x400   : > { %v994_v55 = vpop.xlane.xlu1 %993  ;;  %2015 = vrcp.f32 %v991_v54  ;;  %v1114_v54 = vld [vmem:[#allocation2 + $0x48] sm:$0xff] }
 0x401   : > { %2017 = vrcp.f32 %v994_v55 }
 0x402   : > { %v2010_v56 = vpop.eup %2009 }
 0x403   : > { %v1012_v61 = vmul.f32 %v2010_v56, %v1994_v28 }
 0x404   : > { %v2012_v58 = vpop.eup %2011  ;;  %v1000_v59 = vpop.xlane.xlu1 %999 }
 0x405   : > { %v997_v60 = vpop.xlane.xlu0 %996  ;;  %v1013_v62 = vmul.f32 %v2012_v58, %v1996_v34  ;;  %v1115_v58 = vld [vmem:[#allocation2 + $0x50] sm:$0xff] }
 0x406   : > { %2019 = vrcp.f32 %v997_v60  ;;  %v2014_v0 = vpop.eup %2013 }
 0x407   : > { %2021 = vrcp.f32 %v1000_v59  ;;  %v1020_v63 = vpack.c.bf16 %v1013_v62, %v1012_v61  ;;  %v1014_v3 = vmul.f32 %v2014_v0, %v1998_v37  ;;  %v1117_v0 = vld [vmem:[#allocation2 + $0x60] sm:$0xff] }
 0x409   : > { %v1003_v1 = vpop.xlane.xlu0 %1002  ;;  %1764 = vmatprep.mubr.msk.bf16.mxu1 %vm807_vm0, %v1020_v63 }
 0x40a   : > { %2023 = vrcp.f32 %v1003_v1  ;;  %v2016_v2 = vpop.eup %2015  ;;  %v1118_v1 = vld [vmem:[#allocation2 + $0x68] sm:$0xff] }
 0x40b   : > { %v1015_v4 = vmul.f32 %v2016_v2, %v2000_v40  ;;  %v2018_v8 = vpop.eup %2017  ;;  %v1105_v40 = vld [vmem:[#allocation2] sm:$0xff] }
 0x40c   : > { %v1016_v12 = vmul.f32 %v2018_v8, %v2002_v41  ;;  %v1106_v41 = vld [vmem:[#allocation2 + $0x8] sm:$0xff] }
 0x40d   : > { %v1021_v6 = vpack.c.bf16 %v1015_v4, %v1014_v3  ;;  %v1120_v3 = vld [vmem:[#allocation2 + $0x78] sm:$0xff] }
 0x40f   : > { %1765 = vmatmul.mubr.msk.bf16.vlgmr.msra.gmra.mrb[8].mxu1 %vm807_vm0, %v1021_v6  ;;  %v1121_v6 = vld [vmem:[#allocation2 + $0x80] sm:$0xff] }
 0x410   : > { %v2020_v9 = vpop.eup %2019  ;;  %1226 = vmatpush1.bf16.msra.mxu1 %v1977_v5 }
 0x411   : > { %v2022_v11 = vpop.eup %2021  ;;  %v1017_v13 = vmul.f32 %v2020_v9, %v2006_v45  ;;  %1227 = vmatprep.subr.bf16.mxu1 %v1982_v7 }
 0x412   : > { %v1018_v17 = vmul.f32 %v2022_v11, %v2004_v44 }
 0x413   : > { %v1022_v16 = vpack.c.bf16 %v1017_v13, %v1016_v12  ;;  %v1123_v12 = vld [vmem:[#allocation2 + $0x90] sm:$0xff]  ;;  %v1124_v13 = vld [vmem:[#allocation2 + $0x98] sm:$0xff] }
 0x414   : > { %v2024_v15 = vpop.eup %2023  ;;  %1228 = vmatpush1.bf16.msra.mxu1 %v1980_v10 }
 0x415   : > { %v1019_v18 = vmul.f32 %v2024_v15, %v2008_v48  ;;  %1768 = vmatprep.mubr.msk.bf16.mxu1 %vm807_vm0, %v1022_v16  ;;  %1229 = vmatprep.subr.bf16.mxu1 %v1985_v14  ;;  %v1126_v15 = vld [vmem:[#allocation2 + $0xa8] sm:$0xff] }
 0x417   : > { %v1023_v20 = vpack.c.bf16 %v1019_v18, %v1018_v17  ;;  %v1127_v18 = vld [vmem:[#allocation2 + $0xb0] sm:$0xff] }
 0x418   : > { %1230 = vmatpush1.bf16.msra.mxu1 %v1983_v19 }
 0x419   : > { %1769 = vmatmul.mubr.msk.bf16.gmra.mrb[12].mxu1 %vm807_vm0, %v1023_v20  ;;  %1231 = vmatprep.subr.bf16.mxu1 %v1988_v21 }
 0x41a   : > { %1257 = vmatprep.mubr.bf16.mxu1 %v2122_v57 }
 0x41c   : > { %1232 = vmatpush1.bf16.msra.mxu1 %v1986_v22 }
 0x41d   : > { %1772 = vmatprep.subr.bf16.mxu1 %v1989_v23 }
 0x4e2   : > { %v1766_v24 = vpop.f32.mrb[8].mxu1 }
 0x4e3   : > { %v1074_v25 = vpop.f32.mrb[9].mxu1 }
 0x4e4   : > { %v1767_v26 = vpop.f32.mrb[10].mxu1 }
 0x4e5   : > { %v1130_v27 = vpack.c.bf16 %v1767_v26, %v1766_v24  ;;  %v1077_v28 = vpop.f32.mrb[11].mxu1  ;;  %v1113_v24 = vld [vmem:[#allocation2 + $0x40] sm:$0xff] }
 0x4e6   : > { %v1129_v29 = vpack.c.bf16 %v1077_v28, %v1074_v25  ;;  %v1107_v25 = vld [vmem:[#allocation2 + $0x10] sm:$0xff] }
 0x4e8   : > { %1704 = vmatmul.mubr.msk.bf16.vlgmr.msra.gmra.mrb[16].mxu1 %vm807_vm0, %v1129_v29 }
 0x4e9   : > { %1773 = vmatpush3.bf16.msra.mxu1 %v1989_v23  ;;  %1267 = vmatprep.mubr.bf16.mxu1 %v2122_v57 }
 0x4ea   : > { %1774 = vmatprep.subr.bf16.mxu1 %v1990_v30 }
 0x4ec   : > { %v1770_v33 = vpop.f32.mrb[12].mxu1 }
 0x4ed   : > { %v1090_v34 = vpop.f32.mrb[13].mxu1  ;;  %1775 = vmatpush3.bf16.msra.mxu1 %v1990_v30  ;;  %v1110_v30 = vld [vmem:[#allocation2 + $0x28] sm:$0xff] }
 0x4ee   : > { %v1771_v35 = vpop.f32.mrb[14].mxu1  ;;  %1776 = vmatprep.subr.bf16.mxu1 %v1991_v32 }
 0x4ef   : > { %v1132_v36 = vpack.c.bf16 %v1771_v35, %v1770_v33  ;;  %v1093_v37 = vpop.f32.mrb[15].mxu1 }
 0x4f0   : > { %v1131_v39 = vpack.c.bf16 %v1093_v37, %v1090_v34  ;;  %1705 = vmatmul.mubr.msk.bf16.gmra.mrb[20].mxu1 %vm807_vm0, %v1130_v27  ;;  %v1125_v37 = vld [vmem:[#allocation2 + $0xa0] sm:$0xff] }
 0x4f1   : > { %1277 = vmatprep.mubr.bf16.mxu1 %v2122_v57  ;;  %1777 = vmatpush3.bf16.msra.mxu1 %v1991_v32 }
 0x4f2   : > { %1778 = vmatprep.subr.bf16.mxu1 %v1992_v38 }
 0x4f5   : > { %1779 = vmatpush3.bf16.msra.mxu1 %v1992_v38  ;;  %v1119_v38 = vld [vmem:[#allocation2 + $0x70] sm:$0xff] }
 0x4f8   : > { %1706 = vmatmul.mubr.msk.bf16.gmra.mrb[24].mxu1 %vm807_vm0, %v1131_v39 }
 0x4f9   : > { %1287 = vmatprep.mubr.bf16.mxu1 %v2122_v57 }
 0x500   : > { %1707 = vmatmul.mubr.msk.bf16.gmra.mrb[28].mxu1 %vm807_vm0, %v1132_v36 }
 0x501   : > { %1780 = vmatprep.mubr.msk.bf16.mxu1 %vm807_vm0, %v1129_v29 }
 0x508   : > { %1781 = vmatmul.mubr.msk.bf16.vlgmr.msra.gmra.mrb[32].mxu1 %vm807_vm0, %v1130_v27  ;;  %v1116_v27 = vld [vmem:[#allocation2 + $0x58] sm:$0xff] }
 0x509   : > { %1784 = vmatprep.mubr.msk.bf16.mxu1 %vm807_vm0, %v1131_v39 }
 0x510   : > { %1785 = vmatmul.mubr.msk.bf16.gmra.mrb[36].mxu1 %vm807_vm0, %v1132_v36 }
 0x5bb   : > { %v1259_v42 = vpop.f32.mrb[16].mxu1 }
 0x5bc   : > { %v1363_v44 = vadd.f32 %v1259_v42, %v1105_v40  ;;  %v1261_v45 = vpop.f32.mrb[17].mxu1  ;;  %v1128_v40 = vld [vmem:[#allocation2 + $0xb8] sm:$0xff] }
 0x5bd   : > { %v1364_v47 = vadd.f32 %v1261_v45, %v1106_v41  ;;  %v1263_v48 = vpop.f32.mrb[18].mxu1 }
 0x5be   : > { %1387 = vst [vmem:[#allocation2] sm:$0xff] %v1363_v44  ;;  %v1366_v57 = vadd.f32 %v1263_v48, %v1108_v43  ;;  %v1265_v49 = vpop.f32.mrb[19].mxu1  ;;  %v1122_v43 = vld [vmem:[#allocation2 + $0x88] sm:$0xff] }
 0x5bf   : > { %1388 = vst [vmem:[#allocation2 + $0x8] sm:$0xff] %v1364_v47  ;;  %v1367_v50 = vadd.f32 %v1265_v49, %v1109_v46  ;;  %v1439_v49 = vld [vmem:[%s2473_s3] sm:$0x7] (!%p1712_p1) }
 0x5c0   : > { %1390 = vst [vmem:[#allocation2 + $0x18] sm:$0xff] %v1366_v57 }
 0x5c1   : > { %1391 = vst [vmem:[#allocation2 + $0x20] sm:$0xff] %v1367_v50  ;;  %v1443_v50 = vsub.s32 (!%p1712_p1), 0, %v2322_v31 }
 0x5c3   : > { %v1269_v53 = vpop.f32.mrb[20].mxu1 }
 0x5c4   : > { %v1369_v55 = vadd.f32 %v1269_v53, %v1111_v51  ;;  %v1271_v56 = vpop.f32.mrb[21].mxu1 }
 0x5c5   : > { %v1370_v59 = vadd.f32 %v1271_v56, %v1112_v52  ;;  %v1273_v60 = vpop.f32.mrb[22].mxu1  ;;  %v1415_v57 = vld [vmem:[#allocation2] sm:$0xff] (!%p1712_p1)  ;;  %v1447_v52 = vsub.s32 (!%p1712_p1), 1, %v2322_v31 }
 0x5c6   : > { %1393 = vst [vmem:[#allocation2 + $0x30] sm:$0xff] %v1369_v55  ;;  %v1372_v61 = vadd.f32 %v1273_v60, %v1114_v54  ;;  %v1275_v62 = vpop.f32.mrb[23].mxu1  ;;  %v1416_v51 = vld [vmem:[#allocation2 + $0x8] sm:$0xff] (!%p1712_p1)  ;;  %v1451_v54 = vsub.s32 (!%p1712_p1), 2, %v2322_v31 }
 0x5c7   : > { %1394 = vst [vmem:[#allocation2 + $0x38] sm:$0xff] %v1370_v59  ;;  %v1373_v63 = vadd.f32 %v1275_v62, %v1115_v58  ;;  %v1418_v55 = vld [vmem:[#allocation2 + $0x18] sm:$0xff] (!%p1712_p1)  ;;  %v1444_v58 = vrot.slane (!%p1712_p1), %v1439_v49, %v1443_v50  ;;  %v1448_v59 = vrot.slane (!%p1712_p1), %v1439_v49, %v1447_v52 }
 0x5c8   : > { %1396 = vst [vmem:[#allocation2 + $0x48] sm:$0xff] %v1372_v61  ;;  %v1419_v56 = vld [vmem:[#allocation2 + $0x20] sm:$0xff] (!%p1712_p1) }
 0x5c9   : > { %1397 = vst [vmem:[#allocation2 + $0x50] sm:$0xff] %v1373_v63  ;;  %v1452_v63 = vrot.slane (!%p1712_p1), %v1439_v49, %v1451_v54 }
 0x5cb   : > { %v1279_v2 = vpop.f32.mrb[24].mxu1 }
 0x5cc   : > { %v1375_v4 = vadd.f32 %v1279_v2, %v1117_v0  ;;  %v1281_v5 = vpop.f32.mrb[25].mxu1 }
 0x5cd   : > { %v1376_v7 = vadd.f32 %v1281_v5, %v1118_v1  ;;  %v1283_v8 = vpop.f32.mrb[26].mxu1  ;;  %v1421_v61 = vld [vmem:[#allocation2 + $0x30] sm:$0xff] (!%p1712_p1)  ;;  %v1459_v5 = vadd.f32 (!%p1712_p1), %v1444_v58, %v1418_v55 }
 0x5ce   : > { %1399 = vst [vmem:[#allocation2 + $0x60] sm:$0xff] %v1375_v4  ;;  %v1378_v9 = vadd.f32 %v1283_v8, %v1120_v3  ;;  %v1285_v10 = vpop.f32.mrb[27].mxu1  ;;  %v1422_v62 = vld [vmem:[#allocation2 + $0x38] sm:$0xff] (!%p1712_p1)  ;;  %v1456_v3 = vadd.f32 (!%p1712_p1), %v1444_v58, %v1415_v57  ;;  %v1457_v4 = vadd.f32 (!%p1712_p1), %v1448_v59, %v1416_v51 }
 0x5cf   : > { %1400 = vst [vmem:[#allocation2 + $0x68] sm:$0xff] %v1376_v7  ;;  %v1379_v11 = vadd.f32 %v1285_v10, %v1121_v6  ;;  %v1424_v1 = vld [vmem:[#allocation2 + $0x48] sm:$0xff] (!%p1712_p1)  ;;  %v1460_v6 = vadd.f32 (!%p1712_p1), %v1448_v59, %v1419_v56  ;;  %1483 = vst [vmem:[%s2243_s21 + $0x18] sm:$0xff] (!%p1712_p1), %v1459_v5 }
 0x5d0   : > { %1402 = vst [vmem:[#allocation2 + $0x78] sm:$0xff] %v1378_v9  ;;  %v1425_v2 = vld [vmem:[#allocation2 + $0x50] sm:$0xff] (!%p1712_p1)  ;;  %1480 = vst [vmem:[%s2243_s21] sm:$0xff] (!%p1712_p1), %v1456_v3 }
 0x5d1   : > { %1403 = vst [vmem:[#allocation2 + $0x80] sm:$0xff] %v1379_v11  ;;  %v1462_v11 = vadd.f32 (!%p1712_p1), %v1444_v58, %v1421_v61  ;;  %1481 = vst [vmem:[%s2243_s21 + $0x8] sm:$0xff] (!%p1712_p1), %v1457_v4 }
 0x5d2   : > { %1484 = vst [vmem:[%s2243_s21 + $0x20] sm:$0xff] (!%p1712_p1), %v1460_v6 }
 0x5d3   : > { %v1289_v14 = vpop.f32.mrb[28].mxu1  ;;  %1486 = vst [vmem:[%s2243_s21 + $0x30] sm:$0xff] (!%p1712_p1), %v1462_v11 }
 0x5d4   : > { %v1381_v16 = vadd.f32 %v1289_v14, %v1123_v12  ;;  %v1291_v17 = vpop.f32.mrb[29].mxu1  ;;  %v1463_v12 = vadd.f32 (!%p1712_p1), %v1448_v59, %v1422_v62 }
 0x5d5   : > { %v1382_v19 = vadd.f32 %v1291_v17, %v1124_v13  ;;  %v1293_v20 = vpop.f32.mrb[30].mxu1  ;;  %v1427_v7 = vld [vmem:[#allocation2 + $0x60] sm:$0xff] (!%p1712_p1)  ;;  %v1465_v17 = vadd.f32 (!%p1712_p1), %v1444_v58, %v1424_v1 }
 0x5d6   : > { %1405 = vst [vmem:[#allocation2 + $0x90] sm:$0xff] %v1381_v16  ;;  %v1384_v21 = vadd.f32 %v1293_v20, %v1126_v15  ;;  %v1295_v22 = vpop.f32.mrb[31].mxu1  ;;  %v1428_v8 = vld [vmem:[#allocation2 + $0x68] sm:$0xff] (!%p1712_p1)  ;;  %1487 = vst [vmem:[%s2243_s21 + $0x38] sm:$0xff] (!%p1712_p1), %v1463_v12 }
 0x5d7   : > { %1406 = vst [vmem:[#allocation2 + $0x98] sm:$0xff] %v1382_v19  ;;  %v1385_v23 = vadd.f32 %v1295_v22, %v1127_v18  ;;  %v1430_v14 = vld [vmem:[#allocation2 + $0x78] sm:$0xff] (!%p1712_p1)  ;;  %v1466_v18 = vadd.f32 (!%p1712_p1), %v1448_v59, %v1425_v2  ;;  %1489 = vst [vmem:[%s2243_s21 + $0x48] sm:$0xff] (!%p1712_p1), %v1465_v17 }
 0x5d8   : > { %1408 = vst [vmem:[#allocation2 + $0xa8] sm:$0xff] %v1384_v21  ;;  %v1431_v15 = vld [vmem:[#allocation2 + $0x80] sm:$0xff] (!%p1712_p1) }
 0x5d9   : > { %1409 = vst [vmem:[#allocation2 + $0xb0] sm:$0xff] %v1385_v23  ;;  %v1468_v23 = vadd.f32 (!%p1712_p1), %v1444_v58, %v1427_v7  ;;  %1490 = vst [vmem:[%s2243_s21 + $0x50] sm:$0xff] (!%p1712_p1), %v1466_v18 }
 0x5db   : > { %v1782_v26 = vpop.f32.mrb[32].mxu1  ;;  %1492 = vst [vmem:[%s2243_s21 + $0x60] sm:$0xff] (!%p1712_p1), %v1468_v23 }
 0x5dc   : > { %v1371_v28 = vadd.f32 %v1782_v26, %v1113_v24  ;;  %v1332_v29 = vpop.f32.mrb[33].mxu1  ;;  %v1469_v24 = vadd.f32 (!%p1712_p1), %v1448_v59, %v1428_v8  ;;  %v1471_v26 = vadd.f32 (!%p1712_p1), %v1444_v58, %v1430_v14 }
 0x5dd   : > { %v1365_v32 = vadd.f32 %v1332_v29, %v1107_v25  ;;  %v1783_v33 = vpop.f32.mrb[34].mxu1  ;;  %v1433_v21 = vld [vmem:[#allocation2 + $0x90] sm:$0xff] (!%p1712_p1) }
 0x5de   : > { %1395 = vst [vmem:[#allocation2 + $0x40] sm:$0xff] %v1371_v28  ;;  %v1374_v34 = vadd.f32 %v1783_v33, %v1116_v27  ;;  %v1335_v35 = vpop.f32.mrb[35].mxu1  ;;  %v1434_v22 = vld [vmem:[#allocation2 + $0x98] sm:$0xff] (!%p1712_p1)  ;;  %v1474_v33 = vadd.f32 (!%p1712_p1), %v1444_v58, %v1433_v21  ;;  %1493 = vst [vmem:[%s2243_s21 + $0x68] sm:$0xff] (!%p1712_p1), %v1469_v24 }
 0x5df   : > { %1389 = vst [vmem:[#allocation2 + $0x10] sm:$0xff] %v1365_v32  ;;  %v1368_v36 = vadd.f32 %v1335_v35, %v1110_v30  ;;  %v1436_v28 = vld [vmem:[#allocation2 + $0xa8] sm:$0xff] (!%p1712_p1)  ;;  %v1472_v30 = vadd.f32 (!%p1712_p1), %v1448_v59, %v1431_v15  ;;  %1495 = vst [vmem:[%s2243_s21 + $0x78] sm:$0xff] (!%p1712_p1), %v1471_v26 }
 0x5e0   : > { %1398 = vst [vmem:[#allocation2 + $0x58] sm:$0xff] %v1374_v34  ;;  %v1437_v29 = vld [vmem:[#allocation2 + $0xb0] sm:$0xff] (!%p1712_p1)  ;;  %v1475_v34 = vadd.f32 (!%p1712_p1), %v1448_v59, %v1434_v22  ;;  %1498 = vst [vmem:[%s2243_s21 + $0x90] sm:$0xff] (!%p1712_p1), %v1474_v33 }
 0x5e1   : > { %1392 = vst [vmem:[#allocation2 + $0x28] sm:$0xff] %v1368_v36  ;;  %1496 = vst [vmem:[%s2243_s21 + $0x80] sm:$0xff] (!%p1712_p1), %v1472_v30 }
 0x5e2   : > { %1499 = vst [vmem:[%s2243_s21 + $0x98] sm:$0xff] (!%p1712_p1), %v1475_v34 }
 0x5e3   : > { %v1786_v39 = vpop.f32.mrb[36].mxu1  ;;  %1414 = sbr.rel (%p1712_p1) target bundleno = 1524 (0x5f4), region = 44 }
 0x5e4   : > { %v1383_v41 = vadd.f32 %v1786_v39, %v1125_v37  ;;  %v1348_v42 = vpop.f32.mrb[37].mxu1  ;;  %v1477_v37 = vadd.f32 (!%p1712_p1), %v1444_v58, %v1436_v28 }
 0x5e5   : > { %v1377_v44 = vadd.f32 %v1348_v42, %v1119_v38  ;;  %v1787_v45 = vpop.f32.mrb[38].mxu1  ;;  %v1423_v0 = vld [vmem:[#allocation2 + $0x40] sm:$0xff] (!%p1712_p1)  ;;  %v1478_v38 = vadd.f32 (!%p1712_p1), %v1448_v59, %v1437_v29 }
 0x5e6   : > { %1407 = vst [vmem:[#allocation2 + $0xa0] sm:$0xff] %v1383_v41  ;;  %v1386_v46 = vadd.f32 %v1787_v45, %v1128_v40  ;;  %v1351_v47 = vpop.f32.mrb[39].mxu1  ;;  %v1417_v53 = vld [vmem:[#allocation2 + $0x10] sm:$0xff] (!%p1712_p1)  ;;  %v1464_v16 = vadd.f32 (!%p1712_p1), %v1452_v63, %v1423_v0  ;;  %1501 = vst [vmem:[%s2243_s21 + $0xa8] sm:$0xff] (!%p1712_p1), %v1477_v37 }
 0x5e7   : > { %1401 = vst [vmem:[#allocation2 + $0x70] sm:$0xff] %v1377_v44  ;;  %v1380_v48 = vadd.f32 %v1351_v47, %v1122_v43  ;;  %v1426_v31 = vld [vmem:[#allocation2 + $0x58] sm:$0xff] (!%p1712_p1)  ;;  %v1458_v9 = vadd.f32 (!%p1712_p1), %v1452_v63, %v1417_v53  ;;  %1502 = vst [vmem:[%s2243_s21 + $0xb0] sm:$0xff] (!%p1712_p1), %v1478_v38 }
 0x5e8   : > { %1410 = vst [vmem:[#allocation2 + $0xb8] sm:$0xff] %v1386_v46  ;;  %v1420_v60 = vld [vmem:[#allocation2 + $0x28] sm:$0xff] (!%p1712_p1)  ;;  %v1467_v19 = vadd.f32 (!%p1712_p1), %v1452_v63, %v1426_v31  ;;  %1488 = vst [vmem:[%s2243_s21 + $0x40] sm:$0xff] (!%p1712_p1), %v1464_v16 }
 0x5e9   : > { %1404 = vst [vmem:[#allocation2 + $0x88] sm:$0xff] %v1380_v48  ;;  %v1461_v10 = vadd.f32 (!%p1712_p1), %v1452_v63, %v1420_v60  ;;  %1482 = vst [vmem:[%s2243_s21 + $0x10] sm:$0xff] (!%p1712_p1), %v1458_v9 }
 0x5ea   : > { %1491 = vst [vmem:[%s2243_s21 + $0x58] sm:$0xff] %v1467_v19 }
 0x5eb   : > { %1485 = vst [vmem:[%s2243_s21 + $0x28] sm:$0xff] %v1461_v10 }
 0x5ed   : > { %v1435_v27 = vld [vmem:[#allocation2 + $0xa0] sm:$0xff] }
 0x5ee   : > { %v1429_v13 = vld [vmem:[#allocation2 + $0x70] sm:$0xff]  ;;  %v1476_v36 = vadd.f32 %v1452_v63, %v1435_v27 }
 0x5ef   : > { %v1470_v25 = vadd.f32 %v1452_v63, %v1429_v13  ;;  %v1438_v35 = vld [vmem:[#allocation2 + $0xb8] sm:$0xff] }
 0x5f0   : > { %v1432_v20 = vld [vmem:[#allocation2 + $0x88] sm:$0xff]  ;;  %v1479_v39 = vadd.f32 %v1452_v63, %v1438_v35  ;;  %1500 = vst [vmem:[%s2243_s21 + $0xa0] sm:$0xff] %v1476_v36 }
 0x5f1   : > { %v1473_v32 = vadd.f32 %v1452_v63, %v1432_v20  ;;  %1494 = vst [vmem:[%s2243_s21 + $0x70] sm:$0xff] %v1470_v25 }
 0x5f2   : > { %1503 = vst [vmem:[%s2243_s21 + $0xb8] sm:$0xff] %v1479_v39 }
 0x5f3   : > { %1497 = vst [vmem:[%s2243_s21 + $0x88] sm:$0xff] %v1473_v32 }
 0x5f4 PF: > { %s1812_s18 = smul.u32 3072, %s2107_s19  ;;  %s1518_s7 = sshll.u32 %s2243_s21, 4  ;;  %s2414_s7 = int_to_ptr.vmem [resolvable:$true] %s1518_s7 }
 0x5f5   : > { %s2483_s11 = sand.u32 1, %s2095_s16   ;;  %s2025_s13 = scalar_lea.vmem %s2414_s7, 3072 }
 0x5f6   : > { %s2412_s10 = scalar_lea.hbm %s2474_s4, %s1812_s18  ;;  %s2418_s12 = scalar_lea.sflag [#allocation4], %s2483_s11 }
 0x5f7   : > { %p2026_p2 = scmp.ne.s32.totalorder %s2414_s7, %s2025_s13  ;;  %s2124_s19 = smov [#allocation3]  }
 0x5f8   : > { %s2029_s21 = sshll.u32 %s2124_s19, 4  ;;  %s2030_s21 = int_to_ptr.vmem [resolvable:$false] %s2029_s21 }
 0x5f9   : > { %p2027_p4 = pnand %p2026_p2, %p2201_p3  ;;  %s2031_s14 = scalar_lea.vmem %s2030_s21, 6144 }
 0x5fa   : > { %p2032_p6 = scmp.lt.s32.totalorder %s2414_s7, %s2030_s21  ;;  %p2033_p7 = scmp.lt.s32.totalorder %s2031_s14, %s2025_s13 }
 0x5fb   : > { %p2028_p5 = pneg %p2027_p4 }
 0x5fc   : > { %p2034_p8 = por %p2033_p7, %p2032_p6 }
 0x5fe   : > { %p2035_p10 = pnand %p2034_p8, %p2028_p5 }
 0x600   : > { %2038 = shalt.err (!%p2035_p10)
}
 0x601   : > { %s2039_s23 = scalar_lea.hbm %s2412_s10, 3072  ;;  %s2043_s30 = scalar_lea.hbm %s2474_s4, 6144 }
 0x602   : > { %p2040_p11 = scmp.ne.s32.totalorder %s2412_s10, %s2039_s23  ;;  %p2044_p0 = scmp.lt.u32.totalorder %s2412_s10, %s2474_s4 }
 0x603   : > { %p2045_p1 = scmp.lt.u32.totalorder %s2043_s30, %s2039_s23  ;;  %p2047_p4 = scmp.lt.u32.totalorder %s2039_s23, %s2412_s10 }
 0x604   : > { %p2041_p12 = pnand %p2040_p11, %p2201_p3 }
 0x605   : > { %p2046_p2 = por %p2045_p1, %p2044_p0 }
 0x606   : > { %p2042_p13 = pneg %p2041_p12 }
 0x607   : > { %p2048_p5 = por %p2047_p4, %p2046_p2 }
 0x609   : > { %p2049_p6 = pnand %p2048_p5, %p2042_p13 }
 0x60b   : > { %2052 = shalt.err (!%p2049_p6)
}
 0x60c   : > { %s2125_s6 = smov 384   ;;  %s2126_s18 = smov 24  }
 0x60d   : > { %1813 = dma.vmem_to_hbm [thread:$0]  (%p2201_p3), %s2414_s7, 3072, %s2412_s10, %s2418_s12, %s2125_s6, %s2125_s6, %s2126_s18  }
 0x60e PF: > { %p1819_p7 = scmp.ge.s32.totalorder %s2119_s22, 2  ;;  %s1533_s8 = sand.u32 1, %s2091_s15  }
 0x60f   : > { %s1534_s9 = scalar_lea.sflag [#allocation4], %s1533_s8 }
 0x610   : > { %p1816_p8 = pnand %p1819_p7, %p2211_p9 }
 0x612   : > { %2086 = dma.done.wait (!%p1816_p8), %s1534_s9, 3072  }
 0x613   : > { %2088 = vsyncadd (!%p1816_p8), %s1534_s9, 4294964224  ;;  %s17_s22 = sadd.s32 1, %s2119_s22   ;;  %s2484_s19 = sld [smem:[#allocation6_spill]] }
 0x614   : > { %p14_p10 = scmp.ge.s32.totalorder %s17_s22, 14   ;;  %s2485_s27 = sld [smem:[#allocation7_spill]] }
 0x615   : > { %s2486_s21 = sld [smem:[#allocation8_spill]]  ;;  %s2487_s15 = smov %s2095_s16 }
 0x616   : > { %s2488_s16 = smov %s2099_s17  ;;  %s2489_s17 = smov %s2219_s5 }
 0x617   : > { %s2490_s18 = smov %s2111_s20  ;;  %16 = sbr.rel (!%p14_p10) target bundleno = 5 (0x5), region = 85 }
 0x61a   : > { %s2491_s20 = smov %s2485_s27 }
 0x61e   :  { %1539 = vsyncpa [#allocation4], 1 }
 0x61f   :  { %1541 = vsyncpa [#allocation4 + $0x1], 1 }

</bundles_post_ra>
